<compile_context>
chip_gen: v7x
topology: tpu7x:2x2x1
jax: 0.10.0
libtpu: 0.0.40
codegen_flags: <defaults>
</compile_context>

<pallas_src>
import jax
import jax.numpy as jnp
from jax.experimental import pallas as pl
from jax.experimental.pallas import tpu as pltpu


# ---------------------------------------------------------------------------
# Kernel
# ---------------------------------------------------------------------------
def _mlp_kernel(x_ref, w1_ref, b1_ref, w2_ref, b2_ref, w3d_ref, b3d_ref, o_ref):
    # x_ref:   [9, TB]  bf16 (batch on lanes)
    # w1_ref:  [10, 9]  bf16   b1_ref: [10, 1] f32
    # w2_ref:  [10, 10] bf16   b2_ref: [10, 1] f32
    # w3d_ref: [1, 10]  bf16 (w3[1]-w3[0])   b3d_ref: [1, 1] f32 (b3[1]-b3[0])
    # o_ref:   [2, TB]  bf16
    x = x_ref[...]                                                   # [9, TB] bf16

    # fc1 + ReLU -> [10, TB] f32
    h1 = jnp.dot(w1_ref[...], x, preferred_element_type=jnp.float32)
    h1 = jnp.maximum(h1 + b1_ref[...], 0.0)

    # dropout(0.5): eval-mode identity

    # fc2 + ReLU -> [10, TB] f32
    h2 = jnp.dot(w2_ref[...], h1.astype(jnp.bfloat16),
                 preferred_element_type=jnp.float32)
    h2 = jnp.maximum(h2 + b2_ref[...], 0.0)

    # fc3 folded with the 2-class softmax:
    #   d  = l1 - l0 = (w3[1]-w3[0]) @ h2 + (b3[1]-b3[0])            -> [1, TB]
    #   p0 = 1/(1+exp(d)),  p1 = 1 - p0
    d = jnp.dot(w3d_ref[...], h2.astype(jnp.bfloat16),
                preferred_element_type=jnp.float32)
    d = d + b3d_ref[...]
    p0 = pl.reciprocal(1.0 + jnp.exp(d), approx=True)                # EUP recip
    p0 = jnp.clip(p0, 0.0, 1.0)                                      # strict probabilities

    out = jnp.concatenate([p0, 1.0 - p0], axis=0)                    # [2, TB]
    o_ref[...] = out.astype(o_ref.dtype)                             # single full-block store


# ---------------------------------------------------------------------------
# Batch planning: largest lane-aligned tile, even grid for v7x megacore
# ---------------------------------------------------------------------------
def _round_up(x, m):
    return ((x + m - 1) // m) * m


def _plan_batch(B, *, cap=16384, min_split=2048):
    """Return (B_padded, tile_b).

    * B <= min_split: one big tile (grid=1); per-step overhead dominates any
      megacore win at this size.
    * B > min_split: an EVEN number of grid steps (>=2) so the 'parallel' batch
      axis feeds both TensorCores on v7x; tile_b <= cap keeps the double-buffered
      bf16 x-tile / bf16 out-tile / f32 temporaries well inside 32 MiB VMEM on
      every generation (v7x has only 64 MiB physical).  Padding is <= 255 rows.
    """
    if B <= min_split:
        bp = _round_up(B, 128)                     # lane constraint (batch on lanes)
        return bp, bp
    steps = 2 * max(1, -(-B // (2 * cap)))         # even, >= 2
    tile = _round_up(-(-B // steps), 128)          # multiple of 128, <= cap
    return tile * steps, tile


# ---------------------------------------------------------------------------
# Wrappers
# ---------------------------------------------------------------------------
def _prep_params(params):
    """bf16 weights, f32 column biases, class-difference fc3 row."""
    w1 = params["w1"].astype(jnp.bfloat16)                     # [10, 9]
    w2 = params["w2"].astype(jnp.bfloat16)                     # [10, 10]
    b1 = params["b1"].reshape(10, 1).astype(jnp.float32)
    b2 = params["b2"].reshape(10, 1).astype(jnp.float32)
    w3 = params["w3"].astype(jnp.float32)                      # [2, 10]
    b3 = params["b3"].astype(jnp.float32)                      # [2]
    w3d = (w3[1:2, :] - w3[0:1, :]).astype(jnp.bfloat16)       # [1, 10]
    b3d = (b3[1:2] - b3[0:1]).reshape(1, 1)                    # [1, 1] f32
    return w1, b1, w2, b2, w3d, b3d


def _mlp_pallas(x_t, prepped, tile_b, out_dtype=jnp.bfloat16):
    """x_t: [9, Bp] bf16 with Bp % tile_b == 0 and tile_b % 128 == 0. Returns [2, Bp]."""
    w1, b1, w2, b2, w3d, b3d = prepped
    _, bp = x_t.shape
    grid = (bp // tile_b,)
    full = lambda a: pl.BlockSpec(a.shape, lambda i: (0, 0))   # constant index -> resident

    return pl.pallas_call(
        _mlp_kernel,
        out_shape=jax.ShapeDtypeStruct((2, bp), out_dtype),
        grid_spec=pltpu.PrefetchScalarGridSpec(
            num_scalar_prefetch=0,
            grid=grid,
            in_specs=[
                pl.BlockSpec((9, tile_b), lambda i: (0, i)),   # X tile (lane-dense batch)
                full(w1), full(b1),
                full(w2), full(b2),
                full(w3d), full(b3d),
            ],
            out_specs=pl.BlockSpec((2, tile_b), lambda i: (0, i)),
        ),
        compiler_params=pltpu.CompilerParams(
            dimension_semantics=("parallel",),        # shards batch across TCs on v7x
            vmem_limit_bytes=32 * 1024 * 1024),       # explicit budget, safe on v5e/v6e/v7x
    )(x_t, w1, b1, w2, b2, w3d, b3d)


def mymodule1_forward_t(x_t, params, *, tile_b=None, out_dtype=jnp.bfloat16):
    """Preferred zero-layout-pass API: x_t is [9, B] (B % 128 == 0), returns [2, B]."""
    fin, bp = x_t.shape
    assert fin == 9 and bp % 128 == 0
    if tile_b is None:
        _, tile_b = _plan_batch(bp)
        while bp % tile_b != 0:                      # caller-supplied B: shrink to a divisor
            tile_b -= 128
    assert bp % tile_b == 0 and tile_b % 128 == 0
    return _mlp_pallas(x_t.astype(jnp.bfloat16), _prep_params(params), tile_b, out_dtype)


def mymodule1_forward(x, params):
    """PyTorch-layout API: x [B, 9] f32 -> probabilities [B, 2] f32."""
    B, fin = x.shape
    assert fin == 9
    bp, tile_b = _plan_batch(B)

    # Cast first so the transpose moves half the bytes; pad batch to tile granularity.
    xb = x.astype(jnp.bfloat16)
    if bp != B:
        xb = jnp.pad(xb, ((0, bp - B), (0, 0)))
    x_t = xb.T                                                      # [9, Bp] bf16

    out_t = _mlp_pallas(x_t, _prep_params(params), tile_b)          # [2, Bp] bf16
    return out_t[:, :B].T.astype(jnp.float32)                       # [B, 2] f32


# ---------------------------------------------------------------------------
# Params + pure-JAX reference
# ---------------------------------------------------------------------------
def init_params(key):
    """nn.Linear-style init; shapes match PyTorch: w [out, in], b [out]."""
    k1, k2, k3, k4, k5, k6 = jax.random.split(key, 6)

    def linear(kw, kb, fan_in, fan_out):
        bound = 1.0 / jnp.sqrt(fan_in)
        w = jax.random.uniform(kw, (fan_out, fan_in), jnp.float32, -bound, bound)
        b = jax.random.uniform(kb, (fan_out,), jnp.float32, -bound, bound)
        return w, b

    w1, b1 = linear(k1, k2, 9, 10)
    w2, b2 = linear(k3, k4, 10, 10)
    w3, b3 = linear(k5, k6, 10, 2)
    return dict(w1=w1, b1=b1, w2=w2, b2=b2, w3=w3, b3=b3)


def _reference_forward(x, p):
    """Pure-JAX reference emulating bf16 input/weight rounding (f32 math)."""
    bf = lambda a: a.astype(jnp.bfloat16).astype(jnp.float32)
    h1 = jnp.maximum(bf(x) @ bf(p["w1"]).T + p["b1"][None, :], 0.0)
    h2 = jnp.maximum(bf(h1) @ bf(p["w2"]).T + p["b2"][None, :], 0.0)
    logits = bf(h2) @ bf(p["w3"]).T + p["b3"][None, :]
    return jax.nn.softmax(logits, axis=-1)


if __name__ == "__main__":
    key = jax.random.PRNGKey(0)
    kp, *kxs = jax.random.split(key, 4)
    params = init_params(kp)

    # B=1024: single big tile (grid=1).  B=4096: even 2-step grid (megacore path).
    # B=333:  non-128-multiple batch -> padded to 384 and sliced.
    for kx, B in zip(kxs, (1024, 4096, 333)):
        x = jax.random.normal(kx, (B, 9), dtype=jnp.float32)
        out = jax.block_until_ready(mymodule1_forward(x, params))
        ref = _reference_forward(x, params)

        assert out.shape == (B, 2)
        # rows sum to ~1 (p1 = 1 - p0 in f32, then bf16 output rounding)
        assert jnp.allclose(jnp.sum(out, axis=-1), 1.0, atol=8e-3)
        max_err = float(jnp.max(jnp.abs(out - ref)))
        assert max_err < 1e-2, f"B={B}: mismatch vs reference, max abs err {max_err}"

    print("KERNEL_OK")
</pallas_src>

<mosaic_0001>
module attributes {stable_mosaic.version = 11 : i64} {
  func.func @_mlp_kernel(%arg0: i32, %arg1: memref<9x1024xbf16, #tpu.memory_space<vmem>>, %arg2: memref<10x9xbf16, #tpu.memory_space<vmem>>, %arg3: memref<10x1xf32, #tpu.memory_space<vmem>>, %arg4: memref<10x10xbf16, #tpu.memory_space<vmem>>, %arg5: memref<10x1xf32, #tpu.memory_space<vmem>>, %arg6: memref<1x10xbf16, #tpu.memory_space<vmem>>, %arg7: memref<1x1xf32, #tpu.memory_space<vmem>>, %arg8: memref<2x1024xbf16, #tpu.memory_space<vmem>>) attributes {dimension_semantics = [#tpu.dimension_semantics<parallel>], iteration_bounds = array<i64: 1>, scalar_prefetch = 0 : i64, scratch_operands = 0 : i64, tpu.core_type = #tpu.core_type<tc>, window_params = [{transform_indices = @transform_0, window_bounds = array<i64: 9, 1024>}, {pipeline_mode = #tpu.pipeline_mode<synchronous>, transform_indices = @transform_1, window_bounds = array<i64: 10, 9>}, {pipeline_mode = #tpu.pipeline_mode<synchronous>, transform_indices = @transform_2, window_bounds = array<i64: 10, 1>}, {pipeline_mode = #tpu.pipeline_mode<synchronous>, transform_indices = @transform_3, window_bounds = array<i64: 10, 10>}, {pipeline_mode = #tpu.pipeline_mode<synchronous>, transform_indices = @transform_4, window_bounds = array<i64: 10, 1>}, {pipeline_mode = #tpu.pipeline_mode<synchronous>, transform_indices = @transform_5, window_bounds = array<i64: 1, 10>}, {pipeline_mode = #tpu.pipeline_mode<synchronous>, transform_indices = @transform_6, window_bounds = array<i64: 1, 1>}, {transform_indices = @transform_7, window_bounds = array<i64: 2, 1024>}]} {
    %c0 = arith.constant 0 : index
    %c0_0 = arith.constant 0 : index
    %0 = vector.load %arg1[%c0, %c0_0] : memref<9x1024xbf16, #tpu.memory_space<vmem>>, vector<9x1024xbf16>
    %c0_1 = arith.constant 0 : index
    %c0_2 = arith.constant 0 : index
    %1 = vector.load %arg2[%c0_1, %c0_2] : memref<10x9xbf16, #tpu.memory_space<vmem>>, vector<10x9xbf16>
    %cst = arith.constant dense<0.000000e+00> : vector<10x1024xf32>
    %2 = tpu.matmul %1, %0, %cst {dimension_numbers = #tpu.dot_dimension_numbers<[1], [0], [0], [1], [0, 0, 1, 1], [], []>} : vector<10x9xbf16>, vector<9x1024xbf16>, vector<10x1024xf32> -> vector<10x1024xf32>
    %c0_3 = arith.constant 0 : index
    %c0_4 = arith.constant 0 : index
    %3 = vector.load %arg3[%c0_3, %c0_4] : memref<10x1xf32, #tpu.memory_space<vmem>>, vector<10x1xf32>
    %4 = vector.broadcast %3 : vector<10x1xf32> to vector<10x1024xf32>
    %5 = arith.addf %2, %4 : vector<10x1024xf32>
    %cst_5 = arith.constant 0.000000e+00 : f32
    %6 = vector.broadcast %cst_5 : f32 to vector<10x1024xf32>
    %7 = arith.maximumf %5, %6 : vector<10x1024xf32>
    %c0_6 = arith.constant 0 : index
    %c0_7 = arith.constant 0 : index
    %8 = vector.load %arg4[%c0_6, %c0_7] : memref<10x10xbf16, #tpu.memory_space<vmem>>, vector<10x10xbf16>
    %9 = arith.truncf %7 : vector<10x1024xf32> to vector<10x1024xbf16>
    %cst_8 = arith.constant dense<0.000000e+00> : vector<10x1024xf32>
    %10 = tpu.matmul %8, %9, %cst_8 {dimension_numbers = #tpu.dot_dimension_numbers<[1], [0], [0], [1], [0, 0, 1, 1], [], []>} : vector<10x10xbf16>, vector<10x1024xbf16>, vector<10x1024xf32> -> vector<10x1024xf32>
    %c0_9 = arith.constant 0 : index
    %c0_10 = arith.constant 0 : index
    %11 = vector.load %arg5[%c0_9, %c0_10] : memref<10x1xf32, #tpu.memory_space<vmem>>, vector<10x1xf32>
    %12 = vector.broadcast %11 : vector<10x1xf32> to vector<10x1024xf32>
    %13 = arith.addf %10, %12 : vector<10x1024xf32>
    %cst_11 = arith.constant 0.000000e+00 : f32
    %14 = vector.broadcast %cst_11 : f32 to vector<10x1024xf32>
    %15 = arith.maximumf %13, %14 : vector<10x1024xf32>
    %c0_12 = arith.constant 0 : index
    %c0_13 = arith.constant 0 : index
    %16 = vector.load %arg6[%c0_12, %c0_13] : memref<1x10xbf16, #tpu.memory_space<vmem>>, vector<1x10xbf16>
    %17 = arith.truncf %15 : vector<10x1024xf32> to vector<10x1024xbf16>
    %cst_14 = arith.constant dense<0.000000e+00> : vector<1x1024xf32>
    %18 = tpu.matmul %16, %17, %cst_14 {dimension_numbers = #tpu.dot_dimension_numbers<[1], [0], [0], [1], [0, 0, 1, 1], [], []>} : vector<1x10xbf16>, vector<10x1024xbf16>, vector<1x1024xf32> -> vector<1x1024xf32>
    %c0_15 = arith.constant 0 : index
    %c0_16 = arith.constant 0 : index
    %19 = vector.load %arg7[%c0_15, %c0_16] : memref<1x1xf32, #tpu.memory_space<vmem>>, vector<1x1xf32>
    %20 = vector.broadcast %19 : vector<1x1xf32> to vector<1x1024xf32>
    %21 = arith.addf %18, %20 : vector<1x1024xf32>
    %22 = math.exp %21 : vector<1x1024xf32>
    %cst_17 = arith.constant 1.000000e+00 : f32
    %23 = vector.broadcast %cst_17 : f32 to vector<1x1024xf32>
    %24 = arith.addf %23, %22 : vector<1x1024xf32>
    %25 = tpu.reciprocal %24 {approx = true} : vector<1x1024xf32> -> vector<1x1024xf32>
    %cst_18 = arith.constant 0.000000e+00 : f32
    %cst_19 = arith.constant 1.000000e+00 : f32
    %26 = vector.broadcast %cst_18 : f32 to vector<1x1024xf32>
    %27 = arith.maximumf %26, %25 : vector<1x1024xf32>
    %28 = vector.broadcast %cst_19 : f32 to vector<1x1024xf32>
    %29 = arith.minimumf %28, %27 : vector<1x1024xf32>
    %cst_20 = arith.constant 1.000000e+00 : f32
    %30 = vector.broadcast %cst_20 : f32 to vector<1x1024xf32>
    %31 = arith.subf %30, %29 : vector<1x1024xf32>
    %32 = tpu.concatenate %29, %31 in 0 : vector<1x1024xf32>, vector<1x1024xf32> -> vector<2x1024xf32>
    %33 = arith.truncf %32 : vector<2x1024xf32> to vector<2x1024xbf16>
    %c0_21 = arith.constant 0 : index
    %c0_22 = arith.constant 0 : index
    %34 = vector.load %arg8[%c0_21, %c0_22] : memref<2x1024xbf16, #tpu.memory_space<vmem>>, vector<2x1024xbf16>
    tpu.vector_store %arg8[%c0_21, %c0_22], %33 {strides = array<i32>} : memref<2x1024xbf16, #tpu.memory_space<vmem>>, vector<2x1024xbf16>,
    return
  }
  func.func @transform_0(%arg0: i32) -> (i32, i32) {
    %c0_i32 = arith.constant 0 : i32
    %c0_i32_0 = arith.constant 0 : i32
    return %c0_i32, %arg0 : i32, i32
  }
  func.func @transform_1(%arg0: i32) -> (i32, i32) {
    %c0_i32 = arith.constant 0 : i32
    %c0_i32_0 = arith.constant 0 : i32
    %c0_i32_1 = arith.constant 0 : i32
    return %c0_i32, %c0_i32_0 : i32, i32
  }
  func.func @transform_2(%arg0: i32) -> (i32, i32) {
    %c0_i32 = arith.constant 0 : i32
    %c0_i32_0 = arith.constant 0 : i32
    %c0_i32_1 = arith.constant 0 : i32
    return %c0_i32, %c0_i32_0 : i32, i32
  }
  func.func @transform_3(%arg0: i32) -> (i32, i32) {
    %c0_i32 = arith.constant 0 : i32
    %c0_i32_0 = arith.constant 0 : i32
    %c0_i32_1 = arith.constant 0 : i32
    return %c0_i32, %c0_i32_0 : i32, i32
  }
  func.func @transform_4(%arg0: i32) -> (i32, i32) {
    %c0_i32 = arith.constant 0 : i32
    %c0_i32_0 = arith.constant 0 : i32
    %c0_i32_1 = arith.constant 0 : i32
    return %c0_i32, %c0_i32_0 : i32, i32
  }
  func.func @transform_5(%arg0: i32) -> (i32, i32) {
    %c0_i32 = arith.constant 0 : i32
    %c0_i32_0 = arith.constant 0 : i32
    %c0_i32_1 = arith.constant 0 : i32
    return %c0_i32, %c0_i32_0 : i32, i32
  }
  func.func @transform_6(%arg0: i32) -> (i32, i32) {
    %c0_i32 = arith.constant 0 : i32
    %c0_i32_0 = arith.constant 0 : i32
    %c0_i32_1 = arith.constant 0 : i32
    return %c0_i32, %c0_i32_0 : i32, i32
  }
  func.func @transform_7(%arg0: i32) -> (i32, i32) {
    %c0_i32 = arith.constant 0 : i32
    %c0_i32_0 = arith.constant 0 : i32
    return %c0_i32, %arg0 : i32, i32
  }
}

</mosaic_0001>

<bundles_post_ra>
// kernel: tpu_custom_call.1
= control target key start
LH: loop header
LB: loop body
LE: loop exit
PB: predicated region body
PF: predicated region fallthrough
CT: control target
= control target key end

     0   :  { %s1222_s0 = inlined_call_operand.hbm [shape: bf16[9,1024], index: 0, kind: input, shape index: {}]   ;;  %s1223_s1 = inlined_call_operand.vmem [shape: bf16[10,9], index: 1, kind: input, shape index: {}]   ;;  %s1224_s2 = inlined_call_operand.vmem [shape: f32[10,1], index: 2, kind: input, shape index: {}]   ;;  %s1225_s3 = inlined_call_operand.vmem [shape: bf16[10,10], index: 3, kind: input, shape index: {}]   ;;  %s1226_s4 = inlined_call_operand.vmem [shape: f32[10,1], index: 4, kind: input, shape index: {}]   ;;  %s1227_s5 = inlined_call_operand.vmem [shape: bf16[1,10], index: 5, kind: input, shape index: {}]   ;;  %s1228_s6 = inlined_call_operand.<no memory space> [shape: f32[1,1], index: 6, kind: input, shape index: {}]   ;;  %s1229_s7 = inlined_call_operand.hbm [shape: bf16[2,1024], index: 7, kind: output, shape index: {}]  }
   0x1   :  { %v12_v0 = vstv %s1228_s6 }
   0x2   :  { %13 = vst [vmem:[#allocation2] sm:$0x1] %v12_v0 }
   0x3   :  { %14 = vsyncpa [#allocation4], 0 }
   0x4   :  { %15 = vsyncpa [#allocation5], 0  ;;  %s1072_s26 = smov [#allocation3]   ;;  %s1024_s30 = scalar_lea.hbm %s1222_s0, 1024 }
   0x5   :  { %s21_s27 = sshll.u32 %s1072_s26, 4  ;;  %p1025_p0 = scmp.ne.s32.totalorder %s1222_s0, %s1024_s30  ;;  %s22_s27 = int_to_ptr.vmem [resolvable:$true] %s21_s27 }
   0x6   :  { %p1028_p1 = scmp.lt.u32.totalorder %s1024_s30, %s1222_s0 }
   0x8   :  { %p1030_p2 = pnand %p1028_p1, %p1025_p0 }
   0xa   :  { %1033 = shalt.err (!%p1030_p2)
}
   0xb   :  { %s1034_s6 = scalar_lea.vmem %s22_s27, 1024  ;;  %p1039_p4 = scmp.lt.s32.totalorder %s22_s27, %s22_s27 }
   0xc   :  { %p1035_p3 = scmp.ne.s32.totalorder %s22_s27, %s1034_s6  ;;  %p1040_p5 = scmp.lt.s32.totalorder %s1034_s6, %s1034_s6 }
   0xe   :  { %p1041_p6 = por %p1040_p5, %p1039_p4 }
  0x10   :  { %p1042_p7 = pnand %p1041_p6, %p1035_p3 }
  0x12   :  { %1045 = shalt.err (!%p1042_p7)
}
  0x13   :  { %s1073_s12 = smov 512   ;;  %s1074_s13 = smov 32  }
  0x14   :  { %27 = dma.hbm_to_vmem [thread:$0]  %s1222_s0, 1024, %s22_s27, [#allocation4], %s1073_s12, %s1073_s12, %s1074_s13  }
  0x15   :  { %1068 = dma.done.wait [#allocation4], 1024  }
  0x16   :  { %1069 = vsyncadd [#allocation4], 4294966272  ;;  %vm107_vm0 = vcmask 1043456   ;;  %v1075_v1 = vmov 0   ;;  %vm108_vm1 = vcmask 1044480   ;;  %v1076_v2 = vmov 65535  }
  0x17   :  { %167 = vmatprep.mubr.bf16.mxu0 %v1075_v1  ;;  %210 = vmatprep.mubr.bf16.mxu1 %v1075_v1  ;;  %v109_v3 = vsel %vm107_vm0, 4294967295, %v1076_v2  ;;  %v44_v4 = vld [vmem:[#allocation3] sm:$0xff]  ;;  %v45_v7 = vld [vmem:[#allocation3 + $0x8] sm:$0xff]  ;;  %v46_v13 = vld [vmem:[#allocation3 + $0x10] sm:$0xff]  ;;  %vm103_vm2 = vcmask 72704   ;;  %vm350_vm3 = vcmask 80896  }
  0x18   :  { %988 = vset.pattern.permute.xlu0 %v1075_v1  ;;  %989 = vset.pattern.permute.xlu1 %v1075_v1  ;;  %v48_v5 = vld [vmem:[#allocation3 + $0x20] sm:$0x11]  ;;  %v110_v6 = vsel %vm108_vm1, %v109_v3, 0  ;;  %v49_v9 = vld [vmem:[#allocation3 + $0x28] sm:$0x11]  ;;  %v47_v19 = vld [vmem:[#allocation3 + $0x18] sm:$0xff] }
  0x19   :  { %v949_v8 = vcombine.high %v44_v4, %v48_v5  ;;  %v948_v10 = vcombine.low %v44_v4, %v48_v5  ;;  %v951_v11 = vcombine.high %v45_v7, %v49_v9  ;;  %v950_v12 = vcombine.low %v45_v7, %v49_v9  ;;  %v50_v14 = vld [vmem:[#allocation3 + $0x30] sm:$0x11]  ;;  %v51_v20 = vld [vmem:[#allocation3 + $0x38] sm:$0x11]  ;;  %v54_v21 = vld [vmem:[%s1224_s2] sm:$0xff] }
  0x1a   :  { %v952_v17 = vcombine.low %v46_v13, %v50_v14  ;;  %v953_v18 = vcombine.high %v46_v13, %v50_v14  ;;  %v954_v24 = vcombine.low %v47_v19, %v51_v20  ;;  %v955_v25 = vcombine.high %v47_v19, %v51_v20  ;;  %58 = vperm.xlu0 %988, %v54_v21   ;;  %v990_v26 = vld [vmem:[%s1223_s1] sm:$0x1f]   ;;  %v55_v28 = vld [vmem:[%s1224_s2 + $0x8] sm:$0x3] }
  0x1b   :  { %v115_v15 = vand.u32 %v949_v8, %v110_v6  ;;  %v112_v16 = vand.u32 %v948_v10, %v110_v6  ;;  %v121_v22 = vand.u32 %v951_v11, %v110_v6  ;;  %v118_v23 = vand.u32 %v950_v12, %v110_v6  ;;  %v575_v32 = vld [vmem:[#allocation2] sm:$0x1]  ;;  %v334_v34 = vld [vmem:[%s1226_s4 + $0x8] sm:$0x3] }
  0x1c   :  { %v127_v27 = vand.u32 %v953_v18, %v110_v6  ;;  %v133_v29 = vand.u32 %v955_v25, %v110_v6  ;;  %v124_v30 = vand.u32 %v952_v17, %v110_v6  ;;  %v130_v31 = vand.u32 %v954_v24, %v110_v6  ;;  %v333_v33 = vld [vmem:[%s1226_s4] sm:$0xff] }
  0x1d   :  { %135 = vmatprep.subr.bf16.mxu0 %v115_v15  ;;  %178 = vmatprep.subr.bf16.mxu1 %v121_v22  ;;  %v991_v12 = vld [vmem:[%s1225_s3] sm:$0x1f]   ;;  %vm856_vm4 = vcmask 1040384  }
  0x1e   :  { %136 = vmatpush1.bf16.msra.mxu0 %v112_v16  ;;  %179 = vmatpush1.bf16.msra.mxu1 %v118_v23 }
  0x1f   :  { %221 = vmatprep.subr.bf16.mxu0 %v127_v27  ;;  %264 = vmatprep.subr.bf16.mxu1 %v133_v29 }
  0x20   :  { %63 = vperm.xlu0 %988, %v55_v28   ;;  %337 = vperm.xlu1 %989, %v333_v33  }
  0x21   :  { %956 = vmatmul.mubr.msk.bf16.vlgmr.msra.gmra.mrb[0].mxu0 %vm103_vm2, %v990_v26  ;;  %957 = vmatmul.mubr.msk.bf16.vlgmr.msra.gmra.mrb[0].mxu1 %vm103_vm2, %v990_v26 }
  0x22   :  { %222 = vmatpush1.bf16.msra.mxu0 %v124_v30  ;;  %265 = vmatpush1.bf16.msra.mxu1 %v130_v31 }
  0x23   :  { %253 = vmatprep.mubr.bf16.mxu0 %v1075_v1  ;;  %296 = vmatprep.mubr.bf16.mxu1 %v1075_v1 }
  0x24   :  { %578 = vperm.xlu0 %988, %v575_v32   ;;  %342 = vperm.xlu1 %989, %v334_v34  }
  0x29   :  { %958 = vmatmul.mubr.msk.bf16.vlgmr.msra.gmra.mrb[4].mxu0 %vm103_vm2, %v990_v26  ;;  %959 = vmatmul.mubr.msk.bf16.vlgmr.msra.gmra.mrb[4].mxu1 %vm103_vm2, %v990_v26 }
  0x2a   :  { %410 = vmatprep.mubr.bf16.mxu0 %v1075_v1  ;;  %453 = vmatprep.mubr.bf16.mxu1 %v1075_v1 }
  0x99   :  { %v59_v35 = vpop.permute.xlu0 %58 }
  0x9f   :  { %v64_v36 = vpop.permute.xlu0 %63 }
  0xf4   :  { %v169_v37 = vpop.f32.mrb[0].mxu0  ;;  %v212_v39 = vpop.f32.mrb[0].mxu1 }
  0xf5   :  { %v170_v38 = vadd.f32 %v169_v37, %v59_v35  ;;  %v171_v40 = vpop.f32.mrb[1].mxu0  ;;  %v213_v41 = vadd.f32 %v212_v39, %v59_v35  ;;  %v214_v43 = vpop.f32.mrb[1].mxu1 }
  0xf6   :  { %v172_v42 = vadd.f32 %v171_v40, %v59_v35  ;;  %v173_v44 = vpop.f32.mrb[2].mxu0  ;;  %v215_v45 = vadd.f32 %v214_v43, %v59_v35  ;;  %v216_v47 = vpop.f32.mrb[2].mxu1 }
  0xf7   :  { %v174_v46 = vadd.f32 %v173_v44, %v64_v36  ;;  %v175_v48 = vpop.f32.mrb[3].mxu0  ;;  %v217_v49 = vadd.f32 %v216_v47, %v64_v36  ;;  %v218_v51 = vpop.f32.mrb[3].mxu1  ;;  %v307_v52 = vmax.f32 %v170_v38, 0.0  ;;  %v309_v55 = vmax.f32 %v213_v41, 0.0 }
  0xf8   :  { %v176_v50 = vadd.f32 %v175_v48, %v64_v36  ;;  %v219_v54 = vadd.f32 %v218_v51, %v64_v36  ;;  %v308_v56 = vmax.f32 %v172_v42, 0.0  ;;  %v310_v59 = vmax.f32 %v215_v45, 0.0 }
  0xf9   :  { %v315_v53 = vmax.f32 %v174_v46, 0.0  ;;  %v317_v57 = vmax.f32 %v217_v49, 0.0 }
  0xfa   :  { %v316_v58 = vmax.f32 %v176_v50, 0.0  ;;  %v318_v61 = vmax.f32 %v219_v54, 0.0 }
  0xfb   :  { %v325_v60 = vpack.c.bf16 %v315_v53, %v307_v52  ;;  %v327_v62 = vpack.c.bf16 %v317_v57, %v309_v55 }
  0xfc   :  { %v326_v63 = vpack.c.bf16 %v316_v58, %v308_v56  ;;  %v255_v0 = vpop.f32.mrb[4].mxu0  ;;  %v328_v2 = vpack.c.bf16 %v318_v61, %v310_v59  ;;  %v298_v4 = vpop.f32.mrb[4].mxu1 }
  0xfd   :  { %v256_v3 = vadd.f32 %v255_v0, %v59_v35  ;;  %v257_v5 = vpop.f32.mrb[5].mxu0  ;;  %v355_v6 = vsel %vm108_vm1, %v325_v60, 0  ;;  %v299_v7 = vadd.f32 %v298_v4, %v59_v35  ;;  %v300_v9 = vpop.f32.mrb[5].mxu1  ;;  %v361_v11 = vsel %vm108_vm1, %v327_v62, 0 }
  0xfe   :  { %v258_v8 = vadd.f32 %v257_v5, %v59_v35  ;;  %v259_v10 = vpop.f32.mrb[6].mxu0  ;;  %961 = vmatprep.subr.msk.bf16.mxu0 %vm108_vm1, %v326_v63  ;;  %v301_v13 = vadd.f32 %v300_v9, %v59_v35  ;;  %v302_v15 = vpop.f32.mrb[6].mxu1  ;;  %963 = vmatprep.subr.msk.bf16.mxu1 %vm108_vm1, %v328_v2 }
  0xff   :  { %v260_v14 = vadd.f32 %v259_v10, %v64_v36  ;;  %v261_v16 = vpop.f32.mrb[7].mxu0  ;;  %379 = vmatpush1.bf16.msra.mxu0 %v355_v6  ;;  %v303_v17 = vadd.f32 %v302_v15, %v64_v36  ;;  %v304_v19 = vpop.f32.mrb[7].mxu1  ;;  %422 = vmatpush1.bf16.msra.mxu1 %v361_v11  ;;  %v311_v20 = vmax.f32 %v256_v3, 0.0  ;;  %v313_v23 = vmax.f32 %v299_v7, 0.0 }
 0x100   :  { %v262_v18 = vadd.f32 %v261_v16, %v64_v36  ;;  %v305_v22 = vadd.f32 %v304_v19, %v64_v36  ;;  %v312_v24 = vmax.f32 %v258_v8, 0.0  ;;  %v314_v27 = vmax.f32 %v301_v13, 0.0  ;;  %v338_v35 = vpop.permute.xlu1 %337  ;;  %v566_v16 = vld [vmem:[%s1227_s5] sm:$0x1]  ;;  %s1078_s5 = smov [#allocation6]  }
 0x101   :  { %v319_v21 = vmax.f32 %v260_v14, 0.0  ;;  %v321_v25 = vmax.f32 %v303_v17, 0.0  ;;  %s938_s25 = sshll.u32 %s1078_s5, 4  ;;  %s939_s25 = int_to_ptr.vmem [resolvable:$true] %s938_s25 }
 0x102   :  { %v320_v26 = vmax.f32 %v262_v18, 0.0  ;;  %962 = vmatmul.mubr.msk.bf16.vlgmr.msra.gmra.mrb[8].mxu0 %vm350_vm3, %v991_v12  ;;  %v322_v29 = vmax.f32 %v305_v22, 0.0  ;;  %964 = vmatmul.mubr.msk.bf16.vlgmr.msra.gmra.mrb[8].mxu1 %vm350_vm3, %v991_v12  ;;  %s1046_s26 = scalar_lea.vmem %s939_s25, 128  ;;  %p1051_p9 = scmp.lt.s32.totalorder %s939_s25, %s939_s25 }
 0x103   :  { %v329_v28 = vpack.c.bf16 %v319_v21, %v311_v20  ;;  %496 = vmatprep.mubr.bf16.mxu0 %v1075_v1  ;;  %v331_v30 = vpack.c.bf16 %v321_v25, %v313_v23  ;;  %539 = vmatprep.mubr.bf16.mxu1 %v1075_v1  ;;  %p1047_p8 = scmp.ne.s32.totalorder %s939_s25, %s1046_s26  ;;  %p1052_p10 = scmp.lt.s32.totalorder %s1046_s26, %s1046_s26 }
 0x104   :  { %v330_v31 = vpack.c.bf16 %v320_v26, %v312_v24  ;;  %v332_v32 = vpack.c.bf16 %v322_v29, %v314_v27  ;;  %v343_v36 = vpop.permute.xlu1 %342 }
 0x105   :  { %v367_v33 = vsel %vm108_vm1, %v329_v28, 0  ;;  %v373_v34 = vsel %vm108_vm1, %v331_v30, 0  ;;  %p1053_p11 = por %p1052_p10, %p1051_p9 }
 0x106   :  { %965 = vmatprep.subr.msk.bf16.mxu0 %vm108_vm1, %v330_v31  ;;  %967 = vmatprep.subr.msk.bf16.mxu1 %vm108_vm1, %v332_v32 }
 0x107   :  { %465 = vmatpush1.bf16.msra.mxu0 %v367_v33  ;;  %508 = vmatpush1.bf16.msra.mxu1 %v373_v34  ;;  %p1054_p12 = pnand %p1053_p11, %p1047_p8 }
 0x10a   :  { %966 = vmatmul.mubr.msk.bf16.vlgmr.msra.gmra.mrb[12].mxu0 %vm350_vm3, %v991_v12  ;;  %968 = vmatmul.mubr.msk.bf16.vlgmr.msra.gmra.mrb[12].mxu1 %vm350_vm3, %v991_v12 }
 0x10b   :  { %644 = vmatprep.mubr.bf16.mxu0 %v1075_v1  ;;  %685 = vmatprep.mubr.bf16.mxu1 %v1075_v1 }
 0x1d5   :  { %v412_v37 = vpop.f32.mrb[8].mxu0  ;;  %v455_v39 = vpop.f32.mrb[8].mxu1 }
 0x1d6   :  { %v413_v38 = vadd.f32 %v412_v37, %v338_v35  ;;  %v414_v40 = vpop.f32.mrb[9].mxu0  ;;  %v456_v41 = vadd.f32 %v455_v39, %v338_v35  ;;  %v457_v43 = vpop.f32.mrb[9].mxu1 }
 0x1d7   :  { %v415_v42 = vadd.f32 %v414_v40, %v338_v35  ;;  %v416_v44 = vpop.f32.mrb[10].mxu0  ;;  %v458_v45 = vadd.f32 %v457_v43, %v338_v35  ;;  %v459_v47 = vpop.f32.mrb[10].mxu1 }
 0x1d8   :  { %v417_v46 = vadd.f32 %v416_v44, %v343_v36  ;;  %v418_v48 = vpop.f32.mrb[11].mxu0  ;;  %v460_v49 = vadd.f32 %v459_v47, %v343_v36  ;;  %v461_v51 = vpop.f32.mrb[11].mxu1  ;;  %v550_v52 = vmax.f32 %v413_v38, 0.0  ;;  %v552_v55 = vmax.f32 %v456_v41, 0.0 }
 0x1d9   :  { %v419_v50 = vadd.f32 %v418_v48, %v343_v36  ;;  %v462_v54 = vadd.f32 %v461_v51, %v343_v36  ;;  %v551_v56 = vmax.f32 %v415_v42, 0.0  ;;  %v553_v59 = vmax.f32 %v458_v45, 0.0  ;;  %v579_v37 = vpop.permute.xlu0 %578 }
 0x1da   :  { %v558_v53 = vmax.f32 %v417_v46, 0.0  ;;  %v560_v57 = vmax.f32 %v460_v49, 0.0 }
 0x1db   :  { %v559_v58 = vmax.f32 %v419_v50, 0.0  ;;  %v561_v61 = vmax.f32 %v462_v54, 0.0 }
 0x1dc   :  { %v567_v60 = vpack.c.bf16 %v558_v53, %v550_v52  ;;  %v569_v62 = vpack.c.bf16 %v560_v57, %v552_v55 }
 0x1dd   :  { %v568_v63 = vpack.c.bf16 %v559_v58, %v551_v56  ;;  %v498_v0 = vpop.f32.mrb[12].mxu0  ;;  %v570_v2 = vpack.c.bf16 %v561_v61, %v553_v59  ;;  %v541_v4 = vpop.f32.mrb[12].mxu1 }
 0x1de   :  { %v499_v3 = vadd.f32 %v498_v0, %v338_v35  ;;  %v500_v5 = vpop.f32.mrb[13].mxu0  ;;  %v589_v6 = vsel %vm108_vm1, %v567_v60, 0  ;;  %v542_v7 = vadd.f32 %v541_v4, %v338_v35  ;;  %v543_v9 = vpop.f32.mrb[13].mxu1  ;;  %v595_v11 = vsel %vm108_vm1, %v569_v62, 0 }
 0x1df   :  { %v501_v8 = vadd.f32 %v500_v5, %v338_v35  ;;  %v502_v10 = vpop.f32.mrb[14].mxu0  ;;  %969 = vmatprep.subr.msk.bf16.mxu0 %vm108_vm1, %v568_v63  ;;  %v544_v12 = vadd.f32 %v543_v9, %v338_v35  ;;  %v545_v14 = vpop.f32.mrb[14].mxu1  ;;  %971 = vmatprep.subr.msk.bf16.mxu1 %vm108_vm1, %v570_v2  ;;  %v581_v35 = vlaneseq }
 0x1e0   :  { %v503_v13 = vadd.f32 %v502_v10, %v343_v36  ;;  %v504_v15 = vpop.f32.mrb[15].mxu0  ;;  %613 = vmatpush1.bf16.msra.mxu0 %v589_v6  ;;  %v546_v17 = vadd.f32 %v545_v14, %v343_v36  ;;  %v547_v19 = vpop.f32.mrb[15].mxu1  ;;  %654 = vmatpush1.bf16.msra.mxu1 %v595_v11  ;;  %v554_v20 = vmax.f32 %v499_v3, 0.0  ;;  %v556_v23 = vmax.f32 %v542_v7, 0.0 }
 0x1e1   :  { %v505_v18 = vadd.f32 %v504_v15, %v343_v36  ;;  %v548_v22 = vadd.f32 %v547_v19, %v343_v36  ;;  %v555_v24 = vmax.f32 %v501_v8, 0.0  ;;  %v557_v27 = vmax.f32 %v544_v12, 0.0 }
 0x1e2   :  { %v562_v21 = vmax.f32 %v503_v13, 0.0  ;;  %v564_v25 = vmax.f32 %v546_v17, 0.0  ;;  %v1198_v36 = vshrl.u32 %v581_v35, 7 }
 0x1e3   :  { %v563_v26 = vmax.f32 %v505_v18, 0.0  ;;  %970 = vmatmul.mubr.msk.bf16.vlgmr.msra.gmra.mrb[16].mxu0 %vm350_vm3, %v566_v16  ;;  %v565_v29 = vmax.f32 %v548_v22, 0.0  ;;  %972 = vmatmul.mubr.msk.bf16.vlgmr.msra.gmra.mrb[16].mxu1 %vm350_vm3, %v566_v16 }
 0x1e4   :  { %v571_v28 = vpack.c.bf16 %v562_v21, %v554_v20  ;;  %726 = vmatprep.mubr.bf16.mxu0 %v1075_v1  ;;  %v573_v30 = vpack.c.bf16 %v564_v25, %v556_v23  ;;  %767 = vmatprep.mubr.bf16.mxu1 %v1075_v1  ;;  %v583_v1 = vsub.s32 0, %v1198_v36 }
 0x1e5   :  { %v572_v31 = vpack.c.bf16 %v563_v26, %v555_v24  ;;  %v574_v32 = vpack.c.bf16 %v565_v29, %v557_v27 }
 0x1e6   :  { %v601_v33 = vsel %vm108_vm1, %v571_v28, 0  ;;  %v607_v34 = vsel %vm108_vm1, %v573_v30, 0  ;;  %v584_v38 = vrot.slane %v579_v37, %v583_v1  ;;  %v1077_v28 = vmov 1966171168  }
 0x1e7   :  { %973 = vmatprep.subr.msk.bf16.mxu0 %vm108_vm1, %v572_v31  ;;  %975 = vmatprep.subr.msk.bf16.mxu1 %vm108_vm1, %v574_v32  ;;  %v886_v29 = vunpack.c.l.s4 %v1077_v28 }
 0x1e8   :  { %695 = vmatpush1.bf16.msra.mxu0 %v601_v33  ;;  %736 = vmatpush1.bf16.msra.mxu1 %v607_v34 }
 0x1eb   :  { %974 = vmatmul.mubr.msk.bf16.vlgmr.msra.gmra.mrb[20].mxu0 %vm350_vm3, %v566_v16  ;;  %976 = vmatmul.mubr.msk.bf16.vlgmr.msra.gmra.mrb[20].mxu1 %vm350_vm3, %v566_v16 }
 0x2b6   :  { %v646_v39 = vpop.f32.mrb[16].mxu0  ;;  %v687_v41 = vpop.f32.mrb[16].mxu1 }
 0x2b7   :  { %v647_v40 = vadd.f32 %v646_v39, %v584_v38  ;;  %v648_v42 = vpop.f32.mrb[17].mxu0  ;;  %v688_v43 = vadd.f32 %v687_v41, %v584_v38  ;;  %v689_v45 = vpop.f32.mrb[17].mxu1 }
 0x2b8   :  { %v649_v44 = vadd.f32 %v648_v42, %v584_v38  ;;  %v650_v46 = vpop.f32.mrb[18].mxu0  ;;  %v690_v48 = vadd.f32 %v689_v45, %v584_v38  ;;  %v691_v49 = vpop.f32.mrb[18].mxu1 }
 0x2b9   :  { %v776_v47 = vmul.f32 1.442695, %v647_v40  ;;  %v651_v50 = vpop.f32.mrb[19].mxu0  ;;  %v780_v51 = vmul.f32 1.442695, %v688_v43  ;;  %v692_v53 = vpop.f32.mrb[19].mxu1 }
 0x2ba   :  { %v778_v52 = vmul.f32 1.442695, %v649_v44  ;;  %v782_v54 = vmul.f32 1.442695, %v690_v48 }
 0x2bb   :  { %992 = vpow2.f32 %v776_v47 }
 0x2bc   :  { %994 = vpow2.f32 %v780_v51 }
 0x2bd   :  { %996 = vpow2.f32 %v778_v52 }
 0x2be   :  { %998 = vpow2.f32 %v782_v54  ;;  %v728_v55 = vpop.f32.mrb[20].mxu0  ;;  %v769_v57 = vpop.f32.mrb[20].mxu1 }
 0x2bf   :  { %v729_v56 = vadd.f32 %v728_v55, %v584_v38  ;;  %v730_v58 = vpop.f32.mrb[21].mxu0  ;;  %v770_v59 = vadd.f32 %v769_v57, %v584_v38  ;;  %v771_v61 = vpop.f32.mrb[21].mxu1 }
 0x2c0   :  { %v731_v60 = vadd.f32 %v730_v58, %v584_v38  ;;  %v732_v62 = vpop.f32.mrb[22].mxu0  ;;  %v772_v0 = vadd.f32 %v771_v61, %v584_v38  ;;  %v773_v2 = vpop.f32.mrb[22].mxu1  ;;  %v887_v38 = vunpack.c.0.s8 %v886_v29 }
 0x2c1   :  { %v784_v63 = vmul.f32 1.442695, %v729_v56  ;;  %v733_v3 = vpop.f32.mrb[23].mxu0  ;;  %v788_v4 = vmul.f32 1.442695, %v770_v59  ;;  %v774_v6 = vpop.f32.mrb[23].mxu1 }
 0x2c2   :  { %v786_v5 = vmul.f32 1.442695, %v731_v60  ;;  %v790_v7 = vmul.f32 1.442695, %v772_v0  ;;  %v890_v51 = vsub.s32 %v887_v38, %v1198_v36 }
 0x2c3   :  { %1000 = vpow2.f32 %v784_v63 }
 0x2c4   :  { %1002 = vpow2.f32 %v788_v4 }
 0x2c5   :  { %v993_v8 = vpop.eup %992  ;;  %1004 = vpow2.f32 %v786_v5 }
 0x2c6   :  { %v995_v9 = vpop.eup %994  ;;  %v792_v10 = vadd.f32 1.0, %v993_v8  ;;  %1006 = vpow2.f32 %v790_v7 }
 0x2c7   :  { %v997_v11 = vpop.eup %996  ;;  %v794_v12 = vadd.f32 1.0, %v995_v9 }
 0x2c8   :  { %v999_v13 = vpop.eup %998  ;;  %1008 = vrcp.f32 %v792_v10  ;;  %v793_v14 = vadd.f32 1.0, %v997_v11 }
 0x2c9   :  { %1010 = vrcp.f32 %v794_v12  ;;  %v795_v15 = vadd.f32 1.0, %v999_v13 }
 0x2ca   :  { %1012 = vrcp.f32 %v793_v14 }
 0x2cb   :  { %1014 = vrcp.f32 %v795_v15 }
 0x2cd   :  { %v1001_v16 = vpop.eup %1000 }
 0x2ce   :  { %v1003_v17 = vpop.eup %1002  ;;  %v796_v18 = vadd.f32 1.0, %v1001_v16 }
 0x2cf   :  { %v1005_v19 = vpop.eup %1004  ;;  %v798_v20 = vadd.f32 1.0, %v1003_v17 }
 0x2d0   :  { %v1007_v21 = vpop.eup %1006  ;;  %1016 = vrcp.f32 %v796_v18  ;;  %v797_v22 = vadd.f32 1.0, %v1005_v19 }
 0x2d1   :  { %1018 = vrcp.f32 %v798_v20  ;;  %v799_v23 = vadd.f32 1.0, %v1007_v21 }
 0x2d2   :  { %v1009_v24 = vpop.eup %1008  ;;  %1020 = vrcp.f32 %v797_v22 }
 0x2d3   :  { %v1011_v25 = vpop.eup %1010  ;;  %v808_v26 = vmax.f32 %v1009_v24, 0.0  ;;  %1022 = vrcp.f32 %v799_v23 }
 0x2d4   :  { %v1013_v27 = vpop.eup %1012  ;;  %v810_v30 = vmax.f32 %v1011_v25, 0.0 }
 0x2d5   :  { %v1015_v31 = vpop.eup %1014  ;;  %v816_v32 = vmin.f32 %v808_v26, 1.0  ;;  %v809_v33 = vmax.f32 %v1013_v27, 0.0 }
 0x2d6   :  { %v818_v34 = vmin.f32 %v810_v30, 1.0  ;;  %v811_v35 = vmax.f32 %v1015_v31, 0.0 }
 0x2d7   :  { %v824_v1 = vsub.f32 1.0, %v816_v32  ;;  %v817_v37 = vmin.f32 %v809_v33, 1.0 }
 0x2d8   :  { %v826_v39 = vsub.f32 1.0, %v818_v34  ;;  %v819_v40 = vmin.f32 %v811_v35, 1.0 }
 0x2d9   :  { %v840_v41 = vrot.slane %v824_v1, 7  ;;  %v825_v42 = vsub.f32 1.0, %v817_v37 }
 0x2da   :  { %v1017_v43 = vpop.eup %1016  ;;  %v842_v44 = vrot.slane %v826_v39, 7  ;;  %v827_v45 = vsub.f32 1.0, %v819_v40 }
 0x2db   :  { %v1019_v46 = vpop.eup %1018  ;;  %v857_v47 = vsel %vm856_vm4, %v816_v32, %v840_v41  ;;  %v841_v48 = vrot.slane %v825_v42, 7  ;;  %v812_v49 = vmax.f32 %v1017_v43, 0.0 }
 0x2dc   :  { %v1021_v50 = vpop.eup %1020  ;;  %v859_v52 = vsel %vm856_vm4, %v818_v34, %v842_v44  ;;  %v843_v53 = vrot.slane %v827_v45, 7  ;;  %v814_v54 = vmax.f32 %v1019_v46, 0.0 }
 0x2dd   :  { %v1023_v55 = vpop.eup %1022  ;;  %v858_v56 = vsel %vm856_vm4, %v817_v37, %v841_v48  ;;  %v820_v57 = vmin.f32 %v812_v49, 1.0  ;;  %v813_v58 = vmax.f32 %v1021_v50, 0.0 }
 0x2de   :  { %v860_v59 = vsel %vm856_vm4, %v819_v40, %v843_v53  ;;  %v822_v60 = vmin.f32 %v814_v54, 1.0  ;;  %v815_v61 = vmax.f32 %v1023_v55, 0.0  ;;  %v977_v62 = vpack.c.bf16 %v858_v56, %v857_v47 }
 0x2df   :  { %v828_v63 = vsub.f32 1.0, %v820_v57  ;;  %v821_v0 = vmin.f32 %v813_v58, 1.0  ;;  %v978_v2 = vpack.c.bf16 %v860_v59, %v859_v52 }
 0x2e0   :  { %v830_v3 = vsub.f32 1.0, %v822_v60  ;;  %v823_v4 = vmin.f32 %v815_v61, 1.0  ;;  %v891_v36 = vrot.slane %v977_v62, %v890_v51 }
 0x2e1   :  { %v844_v5 = vrot.slane %v828_v63, 7  ;;  %v829_v6 = vsub.f32 1.0, %v821_v0  ;;  %v898_v7 = vrot.slane %v978_v2, %v890_v51 }
 0x2e2   :  { %v846_v8 = vrot.slane %v830_v3, 7  ;;  %v831_v9 = vsub.f32 1.0, %v823_v4 }
 0x2e3   :  { %v861_v10 = vsel %vm856_vm4, %v820_v57, %v844_v5  ;;  %v845_v11 = vrot.slane %v829_v6, 7  ;;  %v913_v12 = vcombine.low %v891_v36, %v898_v7 }
 0x2e4   :  { %v863_v13 = vsel %vm856_vm4, %v822_v60, %v846_v8  ;;  %v847_v14 = vrot.slane %v831_v9, 7 }
 0x2e5   :  { %v862_v15 = vsel %vm856_vm4, %v821_v0, %v845_v11  ;;  %v921_v22 = vrot.slane %v913_v12, %v890_v51 }
 0x2e6   :  { %v864_v16 = vsel %vm856_vm4, %v823_v4, %v847_v14  ;;  %v979_v17 = vpack.c.bf16 %v862_v15, %v861_v10 }
 0x2e7   :  { %v980_v18 = vpack.c.bf16 %v864_v16, %v863_v13 }
 0x2e8   :  { %v905_v19 = vrot.slane %v979_v17, %v890_v51 }
 0x2e9   :  { %v912_v20 = vrot.slane %v980_v18, %v890_v51 }
 0x2eb   :  { %v914_v21 = vcombine.low %v905_v19, %v912_v20 }
 0x2ed   :  { %v928_v23 = vrot.slane %v914_v21, %v890_v51 }
 0x2ef   :  { %v929_v24 = vcombine.low %v921_v22, %v928_v23 }
 0x2f1   :  { %931 = vst [vmem:[#allocation6] sm:$0xff] %v929_v24 }
 0x2f2   :  { %1057 = shalt.err (!%p1054_p12)
}
 0x2f3   :  { %s1058_s29 = scalar_lea.hbm %s1229_s7, 128 }
 0x2f4   :  { %p1059_p13 = scmp.ne.s32.totalorder %s1229_s7, %s1058_s29  ;;  %p1062_p0 = scmp.lt.u32.totalorder %s1058_s29, %s1229_s7 }
 0x2f6   :  { %p1064_p1 = pnand %p1062_p0, %p1059_p13 }
 0x2f8   :  { %1067 = shalt.err (!%p1064_p1)
}
 0x2f9   :  { %941 = dma.vmem_to_hbm [thread:$0]  %s939_s25, 128, %s1229_s7, [#allocation5]  }
 0x2fa   :  { %1070 = dma.done.wait [#allocation5], 128  }
 0x2fb   :  { %1071 = vsyncadd [#allocation5], 4294967168 }
 0x2fc   :  { %945 = vsyncpa [#allocation4], 1 }
 0x2fd   :  { %946 = vsyncpa [#allocation5], 1 }

</bundles_post_ra>
